<compile_context>
chip_gen: v7x
topology: tpu7x:2x2x1
jax: 0.10.0
libtpu: 0.0.40
codegen_flags: <defaults>
</compile_context>

<pallas_src>
import functools

import jax
import jax.numpy as jnp
from jax.experimental import pallas as pl
from jax.experimental.pallas import tpu as pltpu


def _prenet_kernel(ids_ref, emb_ref, pe_ref, out_ref, *, tl):
    """One (batch b, row-block l) tile of the output.

    ids_ref : SMEM (B, L)   int32    token ids (scalar-prefetched)
    emb_ref : VMEM (V, D)   float32  full embedding table (grid-invariant)
    pe_ref  : VMEM (tl, D)  float32  positional-encoding rows for this block
    out_ref : VMEM (tl, D)  float32  out[b, l*tl : (l+1)*tl, :] (batch squeezed)
    """
    b = pl.program_id(0)
    l0 = pl.program_id(1) * tl

    # True gather: TL dynamic (1, D) row loads from the resident table, driven
    # by cheap SMEM scalar reads of the prefetched ids.  Out-of-range ids
    # would index outside the table (callers must pass valid ids, as with
    # nn.Embedding).
    rows = [emb_ref[pl.ds(ids_ref[b, l0 + r], 1), :] for r in range(tl)]
    gathered = jnp.concatenate(rows, axis=0)                  # (tl, D)

    # Single vectorized add + single full-block store (lane-dense if D%128==0).
    out_ref[...] = (gathered + pe_ref[...]).astype(out_ref.dtype)
    # TODO(synk): nn.Dropout(0.1) is identity in eval mode; training-mode
    # dropout would need pltpu.prng_* and cannot match PyTorch's RNG stream.


def prenet_forward(text, emb_weight, pe, *, tl=None):
    """text: (B, L) int; emb_weight: (V, D) f32; pe: (max_len, D) f32 -> (B, L, D)."""
    B, L = text.shape
    V, D = emb_weight.shape

    if tl is None:
        # Largest convenient row-block that divides L; fall back to the full
        # sequence (a full-extent block dim is always layout-legal).
        tl = next((c for c in (64, 32, 16, 8) if L % c == 0), L)
    assert L % tl == 0, f"row-block tl={tl} must divide L={L}"
    n_lblk = L // tl

    pe_l = pe[:L]                        # slice outside the kernel (cheap XLA op)
    ids = text.astype(jnp.int32)         # (B, L) -> SMEM via scalar prefetch

    kernel = functools.partial(_prenet_kernel, tl=tl)
    grid_spec = pltpu.PrefetchScalarGridSpec(
        num_scalar_prefetch=1,           # ids land in SMEM, feed index_maps/kernel
        grid=(B, n_lblk),
        in_specs=[
            # Embedding table: fully VMEM-resident, grid-invariant (no re-DMA).
            pl.BlockSpec((V, D), lambda b, l, ids_sm: (0, 0)),
            # Positional encoding rows for this L-block: no jnp.tile needed.
            pl.BlockSpec((tl, D), lambda b, l, ids_sm: (l, 0)),
        ],
        # Batch dim squeezed out of the kernel ref; one (tl, D) slab per step.
        out_specs=pl.BlockSpec((None, tl, D), lambda b, l, ids_sm: (b, l, 0)),
    )

    return pl.pallas_call(
        kernel,
        out_shape=jax.ShapeDtypeStruct((B, L, D), emb_weight.dtype),
        grid_spec=grid_spec,
        compiler_params=pltpu.CompilerParams(
            # Independent output tiles on both axes -> shard across TCs (v7x).
            dimension_semantics=("parallel", "parallel")),
    )(ids, emb_weight, pe_l)


def sinusoidal_pe(max_len, d_model):
    """Standard transformer positional encoding (matches PositionalEncoding.pe)."""
    pos = jnp.arange(max_len, dtype=jnp.float32)[:, None]
    i = jnp.arange(0, d_model, 2, dtype=jnp.float32)
    div = jnp.exp(-jnp.log(10000.0) * i / d_model)
    pe = jnp.zeros((max_len, d_model), jnp.float32)
    pe = pe.at[:, 0::2].set(jnp.sin(pos * div))
    pe = pe.at[:, 1::2].set(jnp.cos(pos * div))
    return pe


if __name__ == "__main__":
    # Small hp: n_symbols=40, symbols_embedding_dim = hidden_dim = 128
    # (D=128 keeps the output lane-dense; the kernel works for any D).
    B, L = 2, 32
    n_symbols, D = 40, 128
    max_len = 64

    key = jax.random.PRNGKey(0)
    k_emb, k_txt = jax.random.split(key)

    emb_weight = jax.random.normal(k_emb, (n_symbols, D), dtype=jnp.float32)
    pe = sinusoidal_pe(max_len, D)
    text = jax.random.randint(k_txt, (B, L), 0, n_symbols, dtype=jnp.int32)

    # tl=8 -> grid (2, 4): exercises both grid axes and the pe block indexing.
    out = prenet_forward(text, emb_weight, pe, tl=8)
    out = jax.block_until_ready(out)

    # Pure-JAX reference (eval-mode forward)
    ref = emb_weight[text] + pe[:L][None, :, :]
    assert out.shape == (B, L, D)
    assert jnp.allclose(out, ref, atol=1e-6), "mismatch vs reference"

    print("KERNEL_OK")
</pallas_src>

<mosaic_0001>
module attributes {stable_mosaic.version = 11 : i64} {
  func.func @_prenet_kernel(%arg0: i32, %arg1: i32, %arg2: memref<2x32xi32, #tpu.memory_space<smem>>, %arg3: memref<40x128xf32, #tpu.memory_space<vmem>>, %arg4: memref<8x128xf32, #tpu.memory_space<vmem>>, %arg5: memref<1x8x128xf32, #tpu.memory_space<vmem>>) attributes {dimension_semantics = [#tpu.dimension_semantics<parallel>, #tpu.dimension_semantics<parallel>], iteration_bounds = array<i64: 2, 4>, scalar_prefetch = 1 : i64, scratch_operands = 0 : i64, tpu.core_type = #tpu.core_type<tc>, window_params = [{pipeline_mode = #tpu.pipeline_mode<synchronous>, transform_indices = @transform_0, window_bounds = array<i64: 40, 128>}, {transform_indices = @transform_1, window_bounds = array<i64: 8, 128>}, {transform_indices = @transform_2, window_bounds = array<i64: 1, 8, 128>}]} {
    %c8_i32 = arith.constant 8 : i32
    %0 = arith.muli %arg1, %c8_i32 : i32
    %c0_i32 = arith.constant 0 : i32
    %1 = arith.addi %0, %c0_i32 : i32
    %2 = arith.index_cast %arg0 : i32 to index
    %3 = arith.index_cast %1 : i32 to index
    %4 = memref.load %arg2[%2, %3] : memref<2x32xi32, #tpu.memory_space<smem>>
    %5 = arith.index_cast %4 : i32 to index
    %c0 = arith.constant 0 : index
    %6 = vector.load %arg3[%5, %c0] : memref<40x128xf32, #tpu.memory_space<vmem>>, vector<1x128xf32>
    %c1_i32 = arith.constant 1 : i32
    %7 = arith.addi %0, %c1_i32 : i32
    %8 = arith.index_cast %arg0 : i32 to index
    %9 = arith.index_cast %7 : i32 to index
    %10 = memref.load %arg2[%8, %9] : memref<2x32xi32, #tpu.memory_space<smem>>
    %11 = arith.index_cast %10 : i32 to index
    %c0_0 = arith.constant 0 : index
    %12 = vector.load %arg3[%11, %c0_0] : memref<40x128xf32, #tpu.memory_space<vmem>>, vector<1x128xf32>
    %c2_i32 = arith.constant 2 : i32
    %13 = arith.addi %0, %c2_i32 : i32
    %14 = arith.index_cast %arg0 : i32 to index
    %15 = arith.index_cast %13 : i32 to index
    %16 = memref.load %arg2[%14, %15] : memref<2x32xi32, #tpu.memory_space<smem>>
    %17 = arith.index_cast %16 : i32 to index
    %c0_1 = arith.constant 0 : index
    %18 = vector.load %arg3[%17, %c0_1] : memref<40x128xf32, #tpu.memory_space<vmem>>, vector<1x128xf32>
    %c3_i32 = arith.constant 3 : i32
    %19 = arith.addi %0, %c3_i32 : i32
    %20 = arith.index_cast %arg0 : i32 to index
    %21 = arith.index_cast %19 : i32 to index
    %22 = memref.load %arg2[%20, %21] : memref<2x32xi32, #tpu.memory_space<smem>>
    %23 = arith.index_cast %22 : i32 to index
    %c0_2 = arith.constant 0 : index
    %24 = vector.load %arg3[%23, %c0_2] : memref<40x128xf32, #tpu.memory_space<vmem>>, vector<1x128xf32>
    %c4_i32 = arith.constant 4 : i32
    %25 = arith.addi %0, %c4_i32 : i32
    %26 = arith.index_cast %arg0 : i32 to index
    %27 = arith.index_cast %25 : i32 to index
    %28 = memref.load %arg2[%26, %27] : memref<2x32xi32, #tpu.memory_space<smem>>
    %29 = arith.index_cast %28 : i32 to index
    %c0_3 = arith.constant 0 : index
    %30 = vector.load %arg3[%29, %c0_3] : memref<40x128xf32, #tpu.memory_space<vmem>>, vector<1x128xf32>
    %c5_i32 = arith.constant 5 : i32
    %31 = arith.addi %0, %c5_i32 : i32
    %32 = arith.index_cast %arg0 : i32 to index
    %33 = arith.index_cast %31 : i32 to index
    %34 = memref.load %arg2[%32, %33] : memref<2x32xi32, #tpu.memory_space<smem>>
    %35 = arith.index_cast %34 : i32 to index
    %c0_4 = arith.constant 0 : index
    %36 = vector.load %arg3[%35, %c0_4] : memref<40x128xf32, #tpu.memory_space<vmem>>, vector<1x128xf32>
    %c6_i32 = arith.constant 6 : i32
    %37 = arith.addi %0, %c6_i32 : i32
    %38 = arith.index_cast %arg0 : i32 to index
    %39 = arith.index_cast %37 : i32 to index
    %40 = memref.load %arg2[%38, %39] : memref<2x32xi32, #tpu.memory_space<smem>>
    %41 = arith.index_cast %40 : i32 to index
    %c0_5 = arith.constant 0 : index
    %42 = vector.load %arg3[%41, %c0_5] : memref<40x128xf32, #tpu.memory_space<vmem>>, vector<1x128xf32>
    %c7_i32 = arith.constant 7 : i32
    %43 = arith.addi %0, %c7_i32 : i32
    %44 = arith.index_cast %arg0 : i32 to index
    %45 = arith.index_cast %43 : i32 to index
    %46 = memref.load %arg2[%44, %45] : memref<2x32xi32, #tpu.memory_space<smem>>
    %47 = arith.index_cast %46 : i32 to index
    %c0_6 = arith.constant 0 : index
    %48 = vector.load %arg3[%47, %c0_6] : memref<40x128xf32, #tpu.memory_space<vmem>>, vector<1x128xf32>
    %49 = tpu.concatenate %6, %12, %18, %24, %30, %36, %42, %48 in 0 : vector<1x128xf32>, vector<1x128xf32>, vector<1x128xf32>, vector<1x128xf32>, vector<1x128xf32>, vector<1x128xf32>, vector<1x128xf32>, vector<1x128xf32> -> vector<8x128xf32>
    %c0_7 = arith.constant 0 : index
    %c0_8 = arith.constant 0 : index
    %50 = vector.load %arg4[%c0_7, %c0_8] : memref<8x128xf32, #tpu.memory_space<vmem>>, vector<8x128xf32>
    %51 = arith.addf %49, %50 : vector<8x128xf32>
    %c0_9 = arith.constant 0 : index
    %c0_10 = arith.constant 0 : index
    %c0_11 = arith.constant 0 : index
    %52 = vector.load %arg5[%c0_9, %c0_10, %c0_11] : memref<1x8x128xf32, #tpu.memory_space<vmem>>, vector<1x8x128xf32>
    %53 = vector.shape_cast %52 : vector<1x8x128xf32> to vector<8x128xf32>
    %54 = vector.shape_cast %51 : vector<8x128xf32> to vector<1x8x128xf32>
    tpu.vector_store %arg5[%c0_9, %c0_10, %c0_11], %54 {strides = array<i32>} : memref<1x8x128xf32, #tpu.memory_space<vmem>>, vector<1x8x128xf32>,
    return
  }
  func.func @transform_0(%arg0: i32, %arg1: i32, %arg2: memref<2x32xi32, #tpu.memory_space<smem>>) -> (i32, i32) {
    %c0_i32 = arith.constant 0 : i32
    %c0_i32_0 = arith.constant 0 : i32
    %c0_i32_1 = arith.constant 0 : i32
    return %c0_i32, %c0_i32_0 : i32, i32
  }
  func.func @transform_1(%arg0: i32, %arg1: i32, %arg2: memref<2x32xi32, #tpu.memory_space<smem>>) -> (i32, i32) {
    %c0_i32 = arith.constant 0 : i32
    %c0_i32_0 = arith.constant 0 : i32
    return %arg1, %c0_i32 : i32, i32
  }
  func.func @transform_2(%arg0: i32, %arg1: i32, %arg2: memref<2x32xi32, #tpu.memory_space<smem>>) -> (i32, i32, i32) {
    %c0_i32 = arith.constant 0 : i32
    %c0_i32_0 = arith.constant 0 : i32
    return %arg0, %arg1, %c0_i32 : i32, i32, i32
  }
}

</mosaic_0001>

<bundles_post_ra>
// kernel: tpu_custom_call.1
= control target key start
LH: loop header
LB: loop body
LE: loop exit
PB: predicated region body
PF: predicated region fallthrough
CT: control target
= control target key end

     0   :  { %s1103_s0 = inlined_call_operand.hbm [shape: s32[2,32], index: 0, kind: input, shape index: {}]   ;;  %s1104_s1 = inlined_call_operand.hbm [shape: f32[40,128], index: 1, kind: input, shape index: {}]   ;;  %s1105_s2 = inlined_call_operand.hbm [shape: f32[32,128], index: 2, kind: input, shape index: {}]   ;;  %s1106_s3 = inlined_call_operand.hbm [shape: f32[2,32,128], index: 3, kind: output, shape index: {}]  }
   0x1   :  { %1120 = sst [smem:[#allocation23_spill]] %s1104_s1  ;;  %s579_s14 = scalar_lea.hbm %s1103_s0, 32 }
   0x2   :  { %1121 = sst [smem:[#allocation24_spill]] %s1105_s2  ;;  %p580_p0 = scmp.ne.s32.totalorder %s1103_s0, %s579_s14 }
   0x3   :  { %p583_p1 = scmp.lt.u32.totalorder %s579_s14, %s1103_s0 }
   0x5   :  { %p585_p2 = pnand %p583_p1, %p580_p0 }
   0x7   :  { %588 = shalt.err (!%p585_p2)  }
   0x8   :  { %s777_s19 = smov [#allocation3]  }
   0x9   :  { %9 = dma.hbm_to_smem %s1103_s0, 32, %s777_s19, [#allocation2] }
   0xa   :  { %719 = dma.done.wait [#allocation2], 32 }
   0xb   :  { %720 = vsyncadd [#allocation2], 4294967264 }
   0xc   :  { %11 = sfence }
   0xd   :  { %12 = vsyncpa [#allocation5], 0 }
   0xe   :  { %13 = vsyncpa [#allocation8], 0 }
   0xf   :  { %15 = vsyncpa [#allocation8 + $0x1], 0 }
  0x10   :  { %16 = vsyncpa [#allocation6], 0 }
  0x11   :  { %18 = vsyncpa [#allocation6 + $0x1], 0  ;;  %s815_s22 = smov 0   ;;  %s817_s23 = smov 0  }
  0x12   :  { %s819_s24 = smov 0   ;;  %s821_s25 = smov 0  }
  0x13   :  { %s823_s26 = smov 0   ;;  %s825_s27 = smov 0  }
  0x14   :  { %s827_s0 = smov 0   ;;  %s829_s28 = smov 0  }
  0x15   :  { %s831_s29 = smov 0   ;;  %s833_s30 = smov 0  }
  0x16   :  { %s835_s4 = smov 0  }
  0x17 LB: > { %1122 = sst [smem:[#allocation14_spill]] %s735_s22  ;;  %s438_s5 = sadd.s32 4294967295, %s775_s4   ;;  %s775_s4 = sphi %s835_s4, %s24_s4   ;;  %s771_s30 = sphi %s833_s30, %s1155_s30   ;;  %s767_s29 = sphi %s831_s29, %s1154_s29   ;;  %s763_s28 = sphi %s829_s28, %s1153_s28   ;;  %s759_s0 = sphi %s827_s0, %s1152_s0   ;;  %s755_s27 = sphi %s825_s27, %s1151_s27   ;;  %s751_s26 = sphi %s823_s26, %s1150_s26   ;;  %s747_s25 = sphi %s821_s25, %s1149_s25   ;;  %s743_s24 = sphi %s819_s24, %s1158_s24   ;;  %s739_s23 = sphi %s817_s23, %s1157_s23   ;;  %s735_s22 = sphi %s815_s22, %s1156_s22  }
  0x18   : > { %1123 = sst [smem:[#allocation15_spill]] %s751_s26  ;;  %s439_s6 = sadd.s32 4294967294, %s775_s4  }
  0x19   : > { %1124 = sst [smem:[#allocation16_spill]] %s755_s27  ;;  %p77_p3 = scmp.ne.s32.totalorder %s751_s26, %s747_s25 }
  0x1a   : > { %1125 = sst [smem:[#allocation17_spill]] %s767_s29  ;;  %p871_p4 = scmp.eq.s32.totalorder %s438_s5, 0 }
  0x1b   : > { %1126 = sst [smem:[#allocation18_spill]] %s771_s30  ;;  %p102_p5 = scmp.ne.s32.totalorder %s743_s24, %s739_s23 }
  0x1c   : > { %s1127_s7 = scalar_select %p871_p4, 1, 0 }
  0x1d   : > { %p103_p6 = scmp.eq.s32.totalorder %s438_s5, 7  ;;  %p879_p7 = por %p871_p4, %p77_p3 }
  0x1e   : > { %p108_p8 = scmp.ne.s32.totalorder %s739_s23, %s735_s22  ;;  %p109_p10 = scmp.eq.s32.totalorder %s439_s6, 7 }
  0x1f   : > { %s1128_s8 = scalar_select %p879_p7, 1, 0 }
  0x20   : > { %p885_p9 = por %p103_p6, %p102_p5  ;;  %p440_p11 = scmp.ge.s32.totalorder %s775_s4, 1 }
  0x21   : > { %p116_p12 = scmp.lt.s32.totalorder %s775_s4, 9  ;;  %p891_p13 = por %p109_p10, %p108_p8 }
  0x22   : > { %s1129_s9 = scalar_select %p885_p9, 1, 0 }
  0x23   : > { %s1130_s10 = scalar_select %p891_p13, 1, 0 }
  0x24   : > { %p895_p0 = pnand %p440_p11, %p116_p12  ;;  %s778_s12 = smov [#allocation4]  }
  0x25   : > { %1131 = sst [smem:[#allocation19_spill]] %s1130_s10  ;;  %s128_s13 = sshll.u32 %s778_s12, 4  ;;  %s129_s13 = int_to_ptr.vmem [resolvable:$true] %s128_s13 }
  0x26   : > { %s1132_s11 = scalar_select %p895_p0, 1, 0 }
  0x27   : > { %p471_p1 = pneg %p895_p0  ;;  %s1134_s1 = sld [smem:[#allocation23_spill]] }
  0x29   : > { %p903_p2 = pnand %p471_p1, %p871_p4 }
  0x2b   : > { %p591_p5 = pneg %p903_p2 }
  0x2d   : > { %s589_s17 = scalar_lea.hbm %s1134_s1, 640 }
  0x2e   : > { %p590_p3 = scmp.ne.s32.totalorder %s1134_s1, %s589_s17  ;;  %p596_p10 = scmp.lt.u32.totalorder %s589_s17, %s1134_s1 }
  0x30   : > { %p592_p6 = pnand %p591_p5, %p590_p3 }
  0x32   : > { %p593_p8 = pneg %p592_p6 }
  0x34   : > { %p598_p11 = pnand %p596_p10, %p593_p8 }
  0x36   : > { %601 = shalt.err (!%p598_p11)
}
  0x37   : > { %s602_s25 = scalar_lea.vmem %s129_s13, 640  ;;  %p610_p9 = scmp.lt.s32.totalorder %s129_s13, %s129_s13 }
  0x38   : > { %p603_p12 = scmp.ne.s32.totalorder %s129_s13, %s602_s25  ;;  %p611_p7 = scmp.lt.s32.totalorder %s602_s25, %s602_s25 }
  0x3a   : > { %p605_p1 = pnand %p603_p12, %p591_p5  ;;  %p612_p4 = por %p611_p7, %p610_p9 }
  0x3c   : > { %p606_p13 = pneg %p605_p1 }
  0x3e   : > { %p613_p0 = pnand %p612_p4, %p606_p13 }
  0x40   : > { %616 = shalt.err (!%p613_p0)
}
  0x41   : > { %s779_s5 = smov 128   ;;  %s780_s6 = smov 8  }
  0x42   : > { %474 = dma.hbm_to_vmem [thread:$0]  (!%p903_p2), %s1134_s1, 640, %s129_s13, [#allocation5], %s779_s5, %s779_s5, %s780_s6  }
  0x43   : > { %s33_s16 = sadd.s32 1, %s767_s29  ;;  %s36_s17 = sadd.s32 1, %s771_s30 }
  0x44   : > { %p34_p4 = scmp.ge.s32.totalorder %s33_s16, 4  ;;  %s64_s18 = sadd.s32 1, %s755_s27 }
  0x45   : > { %p71_p7 = scmp.ne.s32.totalorder %s755_s27, %s751_s26  ;;  %p72_p9 = scmp.eq.s32.totalorder %s775_s4, 0 }
  0x46   : > { %s1160_s16 = smov (%p34_p4, %s33_s16), 0  ;;  %s1162_s17 = smov (!%p34_p4, %s36_s17), %s771_s30 }
  0x47   : > { %1135 = sst [smem:[#allocation20_spill]] %s1160_s16  ;;  %s61_s14 = ssub.s32 %s767_s29, %s1160_s16 }
  0x48   : > { %p934_p13 = por %p72_p9, %p71_p7  ;;  %p38_p0 = scmp.ge.s32.totalorder %s1162_s17, 2 }
  0x49   : > { %p62_p2 = scmp.eq.s32.totalorder %s61_s14, 0  ;;  %s92_s13 = sadd.s32 1, %s743_s24 }
  0x4a   : > { %p484_p3 = scmp.lt.s32.totalorder %s775_s4, 8  ;;  %s1164_s17 = smov (%p38_p0, %s1162_s17), 0 }
  0x4b   : > { %1137 = sst [smem:[#allocation21_spill]] %s1164_s17  ;;  %s87_s21 = ssub.s32 %s771_s30, %s1164_s17 }
  0x4c   : > { %s943_s20 = scalar_select %p62_p2, %s755_s27, %s64_s18  }
  0x4d   : > { %s142_s25 = sand.u32 1, %s755_s27   ;;  %s89_s5 = sor.u32 %s87_s21, %s61_s14 }
  0x4e   : > { %1138 = sst [smem:[#allocation22_spill]] %s943_s20  ;;  %p90_p5 = scmp.eq.s32.totalorder %s89_s5, 0 }
  0x4f   : > { %s443_s6 = sshll.u32 %s142_s25, 3  ;;  %s444_s12 = sshll.u32 %s767_s29, 7 }
  0x50   : > { %s950_s15 = scalar_select %p90_p5, %s743_s24, %s92_s13  }
  0x51   : > { %s1139_s2 = sld [smem:[#allocation24_spill]]  ;;  %s146_s22 = scalar_lea.vmem [#allocation7], %s443_s6 }
  0x52   : > { %s153_s18 = sshll.u32 %s146_s22, 4  ;;  %p963_p6 = pnand %p484_p3, %p934_p13  ;;  %s957_s18 = int_to_ptr.vmem [resolvable:$true] %s153_s18 }
  0x53   : > { %s143_s13 = scalar_lea.sflag [#allocation8], %s142_s25 }
  0x54   : > { %p619_p10 = pneg %p963_p6 }
  0x57   : > { %s955_s10 = scalar_lea.hbm %s1139_s2, %s444_s12  ;;  %s622_s19 = scalar_lea.hbm %s1139_s2, 512 }
  0x58   : > { %s617_s1 = scalar_lea.hbm %s955_s10, 128  ;;  %p623_p1 = scmp.lt.u32.totalorder %s955_s10, %s1139_s2 }
  0x59   : > { %p618_p8 = scmp.ne.s32.totalorder %s955_s10, %s617_s1  ;;  %p624_p4 = scmp.lt.u32.totalorder %s622_s19, %s617_s1 }
  0x5a   : > { %p626_p9 = scmp.lt.u32.totalorder %s617_s1, %s955_s10 }
  0x5b   : > { %p620_p11 = pnand %p619_p10, %p618_p8  ;;  %p625_p7 = por %p624_p4, %p623_p1 }
  0x5d   : > { %p621_p12 = pneg %p620_p11  ;;  %p627_p13 = por %p626_p9, %p625_p7 }
  0x5f   : > { %p628_p0 = pnand %p627_p13, %p621_p12 }
  0x61   : > { %631 = shalt.err (!%p628_p0)
}
  0x62   : > { %s632_s25 = scalar_lea.vmem %s957_s18, 128  ;;  %s781_s6 = smov [#allocation7]  }
  0x63   : > { %p633_p2 = scmp.ne.s32.totalorder %s957_s18, %s632_s25  ;;  %s637_s12 = sshll.u32 %s781_s6, 4  ;;  %s638_s12 = int_to_ptr.vmem [resolvable:$false] %s637_s12 }
  0x64   : > { %s639_s22 = scalar_lea.vmem %s638_s12, 256  ;;  %p640_p8 = scmp.lt.s32.totalorder %s957_s18, %s638_s12 }
  0x65   : > { %p635_p3 = pnand %p633_p2, %p619_p10  ;;  %p641_p11 = scmp.lt.s32.totalorder %s639_s22, %s632_s25 }
  0x67   : > { %p636_p5 = pneg %p635_p3  ;;  %p642_p1 = por %p641_p11, %p640_p8 }
  0x69   : > { %p643_p4 = pnand %p642_p1, %p636_p5 }
  0x6b   : > { %646 = shalt.err (!%p643_p4)
}
  0x6c   : > { %478 = dma.hbm_to_vmem [thread:$0]  (!%p963_p6), %s955_s10, 128, %s957_s18, %s143_s13  }
  0x6d   : > { %p1141_p12 = scmp.ne.s32.totalorder %s1132_s11, 0 }
  0x6e   : > { %p1142_p10 = scmp.ne.s32.totalorder (!%p1141_p12), %s1127_s7, 0 }
  0x6f   : > { %162 = sbr.rel (%p1141_p12) target bundleno = 183 (0xb7), region = 28 }
  0x76   : > { %722 = dma.done.wait (%p1142_p10), [#allocation5], 640  }
  0x77   : > { %724 = vsyncadd (%p1142_p10), [#allocation5], 4294966656  ;;  %s168_s1 = sand.u32 1, %s751_s26   ;;  %p1143_p7 = scmp.ne.s32.totalorder %s1128_s8, 0 }
  0x78   : > { %s999_s16 = sshll.u32 %s168_s1, 3  ;;  %s169_s19 = scalar_lea.sflag [#allocation8], %s168_s1 }
  0x79   : > { %726 = dma.done.wait (%p1143_p7), %s169_s19, 128  }
  0x7a   : > { %728 = vsyncadd (%p1143_p7), %s169_s19, 4294967168  ;;  %s1007_s10 = sshll.u32 %s759_s0, 3  ;;  %vm302_vm0 = vcmask 1040384   ;;  %vm304_vm1 = vcmask 1041408   ;;  %vm306_vm2 = vcmask 1042432   ;;  %vm308_vm3 = vcmask 1043456  }
  0x7b   : > { %s194_s7 = sshra.s32 %s1007_s10, 7  ;;  %s199_s13 = sand.u32 127, %s1007_s10  ;;  %vm310_vm4 = vcmask 1044480   ;;  %vm312_vm5 = vcmask 1045504   ;;  %vm314_vm6 = vcmask 1046528  }
  0x7c   : > { %s196_s11 = sadd.s32 %s763_s28, %s194_s7  ;;  %s204_s5 = sadd.s32 1, %s1007_s10 }
  0x7d   : > { %s450_s18 = sshll.u32 %s196_s11, 7  ;;  %s205_s8 = sshra.s32 %s204_s5, 7 }
  0x7e   : > { %s200_s21 = sadd.s32 %s450_s18, %s199_s13  ;;  %s207_s6 = sadd.s32 %s763_s28, %s205_s8 }
  0x7f   : > { %s1013_s25 = sld [smem:[#allocation3 + %s200_s21]]  ;;  %s210_s12 = sand.u32 127, %s204_s5 }
  0x80   : > { %s451_s22 = sshll.u32 %s207_s6, 7  ;;  %s215_s1 = sadd.s32 2, %s1007_s10 }
  0x81   : > { %s211_s19 = sadd.s32 %s451_s22, %s210_s12  ;;  %s216_s14 = sshra.s32 %s215_s1, 7 }
  0x82   : > { %s212_s2 = sld [smem:[#allocation3 + %s211_s19]]  ;;  %s218_s17 = sadd.s32 %s763_s28, %s216_s14 }
  0x83   : > { %s452_s7 = sshll.u32 %s218_s17, 7  ;;  %s221_s11 = sand.u32 127, %s215_s1 }
  0x84   : > { %s222_s30 = sadd.s32 %s452_s7, %s221_s11  ;;  %s226_s13 = sadd.s32 3, %s1007_s10 }
  0x85   : > { %s223_s18 = sld [smem:[#allocation3 + %s222_s30]]  ;;  %s227_s21 = sshra.s32 %s226_s13, 7 }
  0x86   : > { %s232_s29 = sand.u32 127, %s226_s13  ;;  %s229_s20 = sadd.s32 %s763_s28, %s227_s21 }
  0x87   : > { %s237_s27 = sadd.s32 4, %s1007_s10  ;;  %s453_s8 = sshll.u32 %s229_s20, 7 }
  0x88   : > { %s233_s5 = sadd.s32 %s453_s8, %s232_s29  ;;  %s238_s6 = sshra.s32 %s237_s27, 7 }
  0x89   : > { %s234_s12 = sld [smem:[#allocation3 + %s233_s5]]  ;;  %s240_s22 = sadd.s32 %s763_s28, %s238_s6 }
  0x8a   : > { %s213_s26 = scalar_lea.vmem [#allocation4], %s212_s2  ;;  %s454_s14 = sshll.u32 %s240_s22, 7 }
  0x8b   : > { %v214_v0 = vld [vmem:[%s213_s26] sm:$0x1]  ;;  %s243_s17 = sand.u32 127, %s237_s27  ;;  %s248_s1 = sadd.s32 5, %s1007_s10 }
  0x8c   : > { %s244_s19 = sadd.s32 %s454_s14, %s243_s17  ;;  %s249_s30 = sshra.s32 %s248_s1, 7  ;;  %v282_v2 = vrot.slane %v214_v0, 7 }
  0x8d   : > { %s224_s7 = scalar_lea.vmem [#allocation4], %s223_s18  ;;  %s245_s11 = sld [smem:[#allocation3 + %s244_s19]] }
  0x8e   : > { %v225_v1 = vld [vmem:[%s224_s7] sm:$0x1]  ;;  %s251_s13 = sadd.s32 %s763_s28, %s249_s30  ;;  %s202_s20 = scalar_lea.vmem [#allocation4], %s1013_s25 }
  0x8f   : > { %v203_v3 = vld [vmem:[%s202_s20] sm:$0x1]  ;;  %s455_s29 = sshll.u32 %s251_s13, 7  ;;  %s254_s21 = sand.u32 127, %s248_s1  ;;  %v285_v5 = vrot.slane %v225_v1, 6 }
  0x90   : > { %s255_s2 = sadd.s32 %s455_s29, %s254_s21  ;;  %s235_s26 = scalar_lea.vmem [#allocation4], %s234_s12  ;;  %v303_v6 = vsel %vm302_vm0, %v203_v3, %v282_v2 }
  0x91   : > { %v236_v4 = vld [vmem:[%s235_s26] sm:$0x1]  ;;  %s256_s27 = sld [smem:[#allocation3 + %s255_s2]]  ;;  %s259_s8 = sadd.s32 6, %s1007_s10  ;;  %v305_v9 = vsel %vm304_vm1, %v303_v6, %v285_v5 }
  0x92   : > { %s260_s5 = sshra.s32 %s259_s8, 7  ;;  %s265_s18 = sand.u32 127, %s259_s8  ;;  %v288_v7 = vrot.slane %v236_v4, 5 }
  0x93   : > { %s262_s6 = sadd.s32 %s763_s28, %s260_s5  ;;  %s270_s22 = sadd.s32 7, %s1007_s10 }
  0x94   : > { %s456_s25 = sshll.u32 %s262_s6, 7  ;;  %s246_s14 = scalar_lea.vmem [#allocation4], %s245_s11  ;;  %v307_v12 = vsel %vm306_vm2, %v305_v9, %v288_v7 }
  0x95   : > { %v247_v8 = vld [vmem:[%s246_s14] sm:$0x1]  ;;  %s266_s17 = sadd.s32 %s456_s25, %s265_s18  ;;  %s271_s1 = sshra.s32 %s270_s22, 7 }
  0x96   : > { %s267_s12 = sld [smem:[#allocation3 + %s266_s17]]  ;;  %s273_s19 = sadd.s32 %s763_s28, %s271_s1  ;;  %v291_v10 = vrot.slane %v247_v8, 4 }
  0x97   : > { %s457_s30 = sshll.u32 %s273_s19, 7  ;;  %s190_s7 = sand.u32 1, %s739_s23  }
  0x98   : > { %s257_s13 = scalar_lea.vmem [#allocation4], %s256_s27  ;;  %s276_s20 = sand.u32 127, %s270_s22  ;;  %v309_v14 = vsel %vm308_vm3, %v307_v12, %v291_v10 }
  0x99   : > { %v258_v11 = vld [vmem:[%s257_s13] sm:$0x1]  ;;  %s277_s10 = sadd.s32 %s457_s30, %s276_s20  ;;  %s448_s29 = sshll.u32 %s190_s7, 3 }
  0x9a   : > { %s278_s11 = sld [smem:[#allocation3 + %s277_s10]]  ;;  %v294_v13 = vrot.slane %v258_v11, 3  ;;  %s459_s21 = sshll.u32 %s763_s28, 2 }
  0x9b   : > { %s331_s26 = sadd.s32 %s759_s0, %s459_s21  ;;  %s1144_s8 = scalar_lea.vmem [#allocation7], %s999_s16 }
  0x9c   : > { %s268_s2 = scalar_lea.vmem [#allocation4], %s267_s12  ;;  %v311_v17 = vsel %vm310_vm4, %v309_v14, %v294_v13  ;;  %v316_v21 = vld [vmem:[%s1144_s8] sm:$0xff]  ;;  %s192_s5 = scalar_lea.vmem [#allocation9], %s448_s29 }
  0x9d   : > { %v269_v15 = vld [vmem:[%s268_s2] sm:$0x1]  ;;  %s335_s18 = sshll.u32 %s192_s5, 4  ;;  %s460_s6 = sshll.u32 %s331_s26, 7  ;;  %s1036_s18 = int_to_ptr.vmem [resolvable:$true] %s335_s18 }
  0x9e   : > { %v297_v16 = vrot.slane %v269_v15, 2  ;;  %s1041_s0 = scalar_lea.hbm %s1106_s3, %s460_s6  ;;  %s320_s25 = scalar_lea.sflag [#allocation6], %s190_s7 }
  0x9f   : > { %s647_s16 = scalar_lea.vmem %s1036_s18, 128  ;;  %p1145_p9 = scmp.ne.s32.totalorder %s1129_s9, 0 }
  0xa0   : > { %s279_s27 = scalar_lea.vmem [#allocation4], %s278_s11  ;;  %v313_v19 = vsel %vm312_vm5, %v311_v17, %v297_v16  ;;  %p648_p6 = scmp.ne.s32.totalorder %s1036_s18, %s647_s16 }
  0xa1   : > { %v280_v18 = vld [vmem:[%s279_s27] sm:$0x1]  ;;  %s782_s14 = smov [#allocation9]  }
  0xa2   : > { %v300_v20 = vrot.slane %v280_v18, 1  ;;  %p649_p13 = pnand %p648_p6, %p1145_p9  ;;  %s651_s17 = sshll.u32 %s782_s14, 4  ;;  %s652_s17 = int_to_ptr.vmem [resolvable:$false] %s651_s17 }
  0xa3   : > { %s653_s1 = scalar_lea.vmem %s652_s17, 256  ;;  %p654_p2 = scmp.lt.s32.totalorder %s1036_s18, %s652_s17 }
  0xa4   : > { %v315_v22 = vsel %vm314_vm6, %v313_v19, %v300_v20  ;;  %p650_p0 = pneg %p649_p13  ;;  %p655_p3 = scmp.lt.s32.totalorder %s653_s1, %s647_s16 }
  0xa5   : > { %v317_v23 = vadd.f32 %v316_v21, %v315_v22 }
  0xa6   : > { %p656_p5 = por %p655_p3, %p654_p2 }
  0xa7   : > { %318 = vst [vmem:[%s192_s5] sm:$0xff] %v317_v23 }
  0xa8   : > { %p657_p8 = pnand %p656_p5, %p650_p0 }
  0xaa   : > { %660 = shalt.err (!%p657_p8)
}
  0xab   : > { %s661_s12 = scalar_lea.hbm %s1041_s0, 128  ;;  %s665_s7 = scalar_lea.hbm %s1106_s3, 1024 }
  0xac   : > { %p662_p11 = scmp.ne.s32.totalorder %s1041_s0, %s661_s12  ;;  %p666_p12 = scmp.lt.u32.totalorder %s1041_s0, %s1106_s3 }
  0xad   : > { %p667_p10 = scmp.lt.u32.totalorder %s665_s7, %s661_s12  ;;  %p669_p6 = scmp.lt.u32.totalorder %s661_s12, %s1041_s0 }
  0xae   : > { %p663_p1 = pnand %p662_p11, %p1145_p9 }
  0xaf   : > { %p668_p7 = por %p667_p10, %p666_p12 }
  0xb0   : > { %p664_p4 = pneg %p663_p1 }
  0xb1   : > { %p670_p13 = por %p669_p6, %p668_p7 }
  0xb3   : > { %p671_p0 = pnand %p670_p13, %p664_p4 }
  0xb5   : > { %674 = shalt.err (!%p671_p0)
}
  0xb6   : > { %469 = dma.vmem_to_hbm [thread:$0]  (%p1145_p9), %s1036_s18, 128, %s1041_s0, %s320_s25  }
  0xb7 PF: > { %s1146_s10 = sld [smem:[#allocation14_spill]]  ;;  %s1147_s11 = sld [smem:[#allocation19_spill]] }
  0xb8   : > { %p486_p2 = scmp.ge.s32.totalorder %s775_s4, 2 }
  0xbd   : > { %s347_s29 = sand.u32 1, %s1146_s10   ;;  %p1148_p3 = scmp.ne.s32.totalorder %s1147_s11, 0 }
  0xbe   : > { %s348_s21 = scalar_lea.sflag [#allocation6], %s347_s29 }
  0xbf   : > { %p480_p5 = pnand %p486_p2, %p1148_p3 }
  0xc1   : > { %730 = dma.done.wait (!%p480_p5), %s348_s21, 128  }
  0xc2   : > { %732 = vsyncadd (!%p480_p5), %s348_s21, 4294967168  ;;  %s24_s4 = sadd.s32 1, %s775_s4   ;;  %s1149_s25 = sld [smem:[#allocation15_spill]] }
  0xc3   : > { %p21_p8 = scmp.ge.s32.totalorder %s24_s4, 10   ;;  %s1150_s26 = sld [smem:[#allocation16_spill]] }
  0xc4   : > { %s1151_s27 = sld [smem:[#allocation22_spill]]  ;;  %s1152_s0 = sld [smem:[#allocation17_spill]] }
  0xc5   : > { %s1153_s28 = sld [smem:[#allocation18_spill]]  ;;  %s1154_s29 = sld [smem:[#allocation20_spill]] }
  0xc6   : > { %s1155_s30 = sld [smem:[#allocation21_spill]]  ;;  %s1156_s22 = smov %s739_s23 }
  0xc7   : > { %s1157_s23 = smov %s743_s24  ;;  %s1158_s24 = smov %s950_s15 }
  0xc8   :  { %23 = sbr.rel (!%p21_p8) target bundleno = 23 (0x17), region = 86 }
  0xcf   :  { %353 = vsyncpa [#allocation5], 1 }
  0xd0   :  { %355 = vsyncpa [#allocation5 + $0x1], 1 }
  0xd1   :  { %356 = vsyncpa [#allocation8], 1 }
  0xd2   :  { %358 = vsyncpa [#allocation8 + $0x1], 1 }
  0xd3   :  { %359 = vsyncpa [#allocation6], 1 }
  0xd4   :  { %361 = vsyncpa [#allocation6 + $0x1], 1 }

</bundles_post_ra>
